<compile_context>
chip_gen: v6e
topology: v6e:2x2x1
jax: 0.10.0
libtpu: 0.0.40
codegen_flags: <defaults>
</compile_context>

<pallas_src>
import functools

import jax
import jax.numpy as jnp
from jax.experimental import pallas as pl
from jax.experimental.pallas import tpu as pltpu

_LANE = 128
_SUBLANE = 8


def _is_v7x():
    try:
        return "v7" in jax.devices()[0].device_kind.lower()
    except Exception:
        return False


def _sse_kernel(img_ref, lbl_ref, out_ref, *, row_tile, acc_rows,
                blocks_per_part, num_valid_rows):
    c = pl.program_id(0)   # partial index ("parallel"; a core on v7x)
    i = pl.program_id(1)   # row-block index within this partial ("arbitrary")

    # Zero this partial's resident (1, acc_rows, 128) accumulator block.
    @pl.when(i == 0)
    def _():
        out_ref[...] = jnp.zeros_like(out_ref)

    block_idx = c * blocks_per_part + i

    d = img_ref[...].astype(jnp.float32) - lbl_ref[...].astype(jnp.float32)
    sq = d * d

    # Blocks whose every row is valid (the common case).
    full_blocks = num_valid_rows // row_tile

    # Fast path: no masking, just the widened multi-chain reduce + accumulate.
    @pl.when(block_idx < full_blocks)
    def _():
        out_ref[...] += sq.reshape(
            row_tile // acc_rows, acc_rows, _LANE).sum(axis=0, keepdims=True)

    # Boundary / clamped-duplicate blocks: mask by global row index using a
    # single (row_tile, 1) iota.  Keep it a select (not mask-multiply) so
    # unspecified OOB data (possibly NaN/Inf) is zeroed correctly.
    # Note: row indexing is int32 -> supports tensors up to ~2^31 rows
    # (~2.7e11 elements), far beyond practical sizes.
    @pl.when(block_idx >= full_blocks)
    def _():
        row_in_block = jax.lax.broadcasted_iota(jnp.int32, (row_tile, 1), 0)
        valid = (block_idx * row_tile + row_in_block) < num_valid_rows
        msq = jnp.where(valid, sq, 0.0)
        out_ref[...] += msq.reshape(
            row_tile // acc_rows, acc_rows, _LANE).sum(axis=0, keepdims=True)


def psnr(image, label, *, row_tile=None, num_parts=None):
    """Computes PSNR(image, label); returns a float32 array of shape (1,)."""
    assert image.shape == label.shape, (image.shape, label.shape)
    total_elems = image.size
    assert total_elems > 0

    img_flat = jnp.ravel(image)
    lbl_flat = jnp.ravel(label)

    itemsize = jnp.dtype(image.dtype).itemsize
    sublane_mult = max(_SUBLANE, 32 // itemsize)   # 8 f32 / 16 bf16 / 32 int8
    row_bytes = _LANE * itemsize

    # Lane-aligned kernel region (multiple of sublane_mult*128 elements); the
    # tiny ragged remainder (< sublane_mult*128 elements) is summed directly
    # in XLA, so no full-tensor pad copy is ever materialized.
    # TODO(synk): for ragged sizes the prefix slice may still materialize one
    # prefix copy; a manual-DMA kernel over the raw flat array would avoid it.
    chunk = sublane_mult * _LANE
    n_main = (total_elems // chunk) * chunk

    if n_main < total_elems:
        tail_sse = jnp.sum(
            (img_flat[n_main:].astype(jnp.float32)
             - lbl_flat[n_main:].astype(jnp.float32)) ** 2,
            dtype=jnp.float32)
    else:
        tail_sse = jnp.float32(0.0)

    if n_main == 0:
        # Tiny input: everything handled by the XLA epilogue above.
        sse = tail_sse
    else:
        rows = n_main // _LANE                     # multiple of sublane_mult
        img2d = img_flat[:n_main].reshape(rows, _LANE)
        lbl2d = lbl_flat[:n_main].reshape(rows, _LANE)

        is_v7x = _is_v7x()
        # Per-input block target: 2 MiB saturates HBM on v5e/v6e; 4 MiB on
        # v7x (3+ TB/s HBM) to amortize the fixed per-grid-step overhead.
        target_block_bytes = (4 if is_v7x else 2) * 1024 * 1024
        if row_tile is None:
            row_tile = target_block_bytes // row_bytes
        row_tile = max(sublane_mult, (row_tile // sublane_mult) * sublane_mult)
        row_tile = min(row_tile, rows)

        # Widened accumulator: breaks the per-block reduce into independent
        # per-sublane-group add chains (chain depth row_tile/acc_rows).
        acc_rows = 64
        while row_tile % acc_rows != 0:
            acc_rows //= 2

        nb = pl.cdiv(rows, row_tile)               # logical row-blocks
        if num_parts is None:
            # 2 parts only on the dual-TensorCore v7x and only when there is
            # enough work; 1-TC chips gain nothing from the extra split.
            num_parts = 2 if (is_v7x and nb >= 4) else 1
        num_parts = max(1, min(int(num_parts), nb))
        bpp = pl.cdiv(nb, num_parts)               # row-blocks per partial

        def in_map(c, i):
            # Clamp so the pipelined DMA never starts past the array end;
            # logically out-of-range (duplicate) blocks are masked in-kernel.
            return (jnp.minimum(c * bpp + i, nb - 1), 0)

        kernel = functools.partial(
            _sse_kernel, row_tile=row_tile, acc_rows=acc_rows,
            blocks_per_part=bpp, num_valid_rows=rows)

        # VMEM budget: 2 inputs x 2 pipeline buffers in the native dtype plus
        # f32-sized temporaries (diff / square / masked) which are 4-byte
        # regardless of input dtype, plus slack.  Capped below v7x's 64 MiB
        # physical VMEM.
        block_bytes = row_tile * row_bytes
        f32_block_bytes = row_tile * _LANE * 4
        vmem_need = 4 * block_bytes + 4 * f32_block_bytes + (2 << 20)
        vmem_limit = int(min(max(32 * 1024 * 1024, vmem_need),
                             56 * 1024 * 1024))

        partials = pl.pallas_call(
            kernel,
            out_shape=jax.ShapeDtypeStruct((num_parts, acc_rows, _LANE),
                                           jnp.float32),
            grid_spec=pltpu.PrefetchScalarGridSpec(
                num_scalar_prefetch=0,
                grid=(num_parts, bpp),
                in_specs=[
                    pl.BlockSpec((row_tile, _LANE), in_map),
                    pl.BlockSpec((row_tile, _LANE), in_map),
                ],
                out_specs=pl.BlockSpec((1, acc_rows, _LANE),
                                       lambda c, i: (c, 0, 0)),
            ),
            compiler_params=pltpu.CompilerParams(
                dimension_semantics=("parallel", "arbitrary"),
                vmem_limit_bytes=vmem_limit,
            ),
        )(img2d, lbl2d)

        # Tiny finalize in XLA: fold a handful of vregs of partials.
        sse = jnp.sum(partials, dtype=jnp.float32) + tail_sse

    mse = sse / jnp.float32(total_elems)
    psnr_val = 10.0 * jnp.log(1.0 / mse) / jnp.log(jnp.float32(10.0))
    return psnr_val.reshape(1)   # matches the torch output shape (1,)


if __name__ == "__main__":
    key = jax.random.PRNGKey(0)
    k_img, k_noise, k_extra, k_r = jax.random.split(key, 4)

    def ref_psnr(a, b):
        mse = jnp.mean((a.astype(jnp.float32) - b.astype(jnp.float32)) ** 2)
        return 10.0 * jnp.log(1.0 / mse) / jnp.log(10.0)

    def check(res, a, b, tag):
        assert res.shape == (1,), (tag, res.shape)
        ref = ref_psnr(a, b)
        assert jnp.allclose(res[0], ref, rtol=1e-4, atol=1e-4), (tag, res, ref)

    # NCHW inputs, values in [0, 1] like typical image tensors.
    shape = (2, 4, 16, 16)
    label = jax.random.uniform(k_img, shape, dtype=jnp.float32)
    image = jnp.clip(
        label + 0.05 * jax.random.normal(k_noise, shape, dtype=jnp.float32),
        0.0, 1.0,
    )

    # 1) Default path (single full block, fast path only).
    r1 = psnr(image, label)
    # 2) Multi-block + explicit two-partial split (exercises the parallel axis).
    r2 = psnr(image, label, row_tile=8, num_parts=2)
    # 3) Partial last block (rows not a multiple of row_tile -> masked branch).
    shape3 = (3, 4, 16, 16)
    label3 = jax.random.uniform(k_extra, shape3, dtype=jnp.float32)
    image3 = label3 + 0.1
    r3 = psnr(image3, label3, row_tile=16)
    # 4) Clamped duplicate block (nb=3 with 2 partials -> fully-masked block).
    shape4 = (3, 4, 16, 32)
    label4 = jax.random.uniform(k_r, shape4, dtype=jnp.float32)
    image4 = label4 - 0.07
    r4 = psnr(image4, label4, row_tile=16, num_parts=2)
    # 5) Ragged remainder (element count not a multiple of 128) -> XLA tail.
    shape5 = (2, 3, 179)   # 1074 elements: 1024 in-kernel + 50-element tail
    label5 = jax.random.uniform(k_noise, shape5, dtype=jnp.float32)
    image5 = label5 + 0.02
    r5 = psnr(image5, label5)

    jax.block_until_ready((r1, r2, r3, r4, r5))

    check(r1, image, label, "default")
    check(r2, image, label, "two-partial")
    check(r3, image3, label3, "partial-block")
    check(r4, image4, label4, "clamped-block")
    check(r5, image5, label5, "ragged-tail")

    print("KERNEL_OK")
</pallas_src>

<mosaic_0001>
module attributes {stable_mosaic.version = 11 : i64} {
  func.func @_sse_kernel(%arg0: i32, %arg1: i32, %arg2: memref<16x128xf32, #tpu.memory_space<vmem>>, %arg3: memref<16x128xf32, #tpu.memory_space<vmem>>, %arg4: memref<1x16x128xf32, #tpu.memory_space<vmem>>) attributes {dimension_semantics = [#tpu.dimension_semantics<parallel>, #tpu.dimension_semantics<arbitrary>], iteration_bounds = array<i64: 1, 1>, scalar_prefetch = 0 : i64, scratch_operands = 0 : i64, tpu.core_type = #tpu.core_type<tc>, window_params = [{transform_indices = @transform_0, window_bounds = array<i64: 16, 128>}, {transform_indices = @transform_1, window_bounds = array<i64: 16, 128>}, {transform_indices = @transform_2, window_bounds = array<i64: 1, 16, 128>}]} {
    %c0_i32 = arith.constant 0 : i32
    %0 = arith.cmpi eq, %arg1, %c0_i32 : i32
    %1 = arith.extui %0 : i1 to i32
    %c0_i32_0 = arith.constant 0 : i32
    %2 = arith.cmpi ne, %1, %c0_i32_0 : i32
    scf.if %2 {
      %cst = arith.constant 0.000000e+00 : f32
      %15 = vector.broadcast %cst : f32 to vector<1x16x128xf32>
      %c0_8 = arith.constant 0 : index
      %c0_9 = arith.constant 0 : index
      %c0_10 = arith.constant 0 : index
      %16 = vector.load %arg4[%c0_8, %c0_9, %c0_10] : memref<1x16x128xf32, #tpu.memory_space<vmem>>, vector<1x16x128xf32>
      tpu.vector_store %arg4[%c0_8, %c0_9, %c0_10], %15 {strides = array<i32>} : memref<1x16x128xf32, #tpu.memory_space<vmem>>, vector<1x16x128xf32>,
    } else {
    }
    %c1_i32 = arith.constant 1 : i32
    %3 = arith.muli %arg0, %c1_i32 : i32
    %4 = arith.addi %3, %arg1 : i32
    %c0 = arith.constant 0 : index
    %c0_1 = arith.constant 0 : index
    %5 = vector.load %arg2[%c0, %c0_1] : memref<16x128xf32, #tpu.memory_space<vmem>>, vector<16x128xf32>
    %c0_2 = arith.constant 0 : index
    %c0_3 = arith.constant 0 : index
    %6 = vector.load %arg3[%c0_2, %c0_3] : memref<16x128xf32, #tpu.memory_space<vmem>>, vector<16x128xf32>
    %7 = arith.subf %5, %6 : vector<16x128xf32>
    %8 = arith.mulf %7, %7 : vector<16x128xf32>
    %c1_i32_4 = arith.constant 1 : i32
    %9 = arith.cmpi slt, %4, %c1_i32_4 : i32
    %10 = arith.extui %9 : i1 to i32
    %c0_i32_5 = arith.constant 0 : i32
    %11 = arith.cmpi ne, %10, %c0_i32_5 : i32
    scf.if %11 {
      %c0_8 = arith.constant 0 : index
      %c0_9 = arith.constant 0 : index
      %c0_10 = arith.constant 0 : index
      %15 = vector.load %arg4[%c0_8, %c0_9, %c0_10] : memref<1x16x128xf32, #tpu.memory_space<vmem>>, vector<1x16x128xf32>
      %16 = vector.shape_cast %8 : vector<16x128xf32> to vector<1x16x128xf32>
      %cst = arith.constant dense<0.000000e+00> : vector<16x128xf32>
      %17 = vector.multi_reduction <add>, %16, %cst [0] : vector<1x16x128xf32> to vector<16x128xf32>
      %18 = vector.shape_cast %17 : vector<16x128xf32> to vector<1x16x128xf32>
      %19 = arith.addf %15, %18 : vector<1x16x128xf32>
      %c0_11 = arith.constant 0 : index
      %c0_12 = arith.constant 0 : index
      %c0_13 = arith.constant 0 : index
      %20 = vector.load %arg4[%c0_11, %c0_12, %c0_13] : memref<1x16x128xf32, #tpu.memory_space<vmem>>, vector<1x16x128xf32>
      tpu.vector_store %arg4[%c0_11, %c0_12, %c0_13], %19 {strides = array<i32>} : memref<1x16x128xf32, #tpu.memory_space<vmem>>, vector<1x16x128xf32>,
    } else {
    }
    %c1_i32_6 = arith.constant 1 : i32
    %12 = arith.cmpi sge, %4, %c1_i32_6 : i32
    %13 = arith.extui %12 : i1 to i32
    %c0_i32_7 = arith.constant 0 : i32
    %14 = arith.cmpi ne, %13, %c0_i32_7 : i32
    scf.if %14 {
      %15 = tpu.iota {dimensions = array<i32: 0>} : vector<16x1xi32>
      %c16_i32 = arith.constant 16 : i32
      %16 = arith.muli %4, %c16_i32 : i32
      %17 = vector.broadcast %16 : i32 to vector<16x1xi32>
      %18 = arith.addi %17, %15 : vector<16x1xi32>
      %c16_i32_8 = arith.constant 16 : i32
      %19 = vector.broadcast %c16_i32_8 : i32 to vector<16x1xi32>
      %20 = arith.cmpi slt, %18, %19 : vector<16x1xi32>
      %cst = arith.constant 0.000000e+00 : f32
      %21 = vector.shape_cast %20 : vector<16x1xi1> to vector<16x1xi1>
      %22 = vector.broadcast %21 : vector<16x1xi1> to vector<16x128xi1>
      %23 = vector.broadcast %cst : f32 to vector<16x128xf32>
      %24 = arith.select %22, %8, %23 : vector<16x128xi1>, vector<16x128xf32>
      %c0_9 = arith.constant 0 : index
      %c0_10 = arith.constant 0 : index
      %c0_11 = arith.constant 0 : index
      %25 = vector.load %arg4[%c0_9, %c0_10, %c0_11] : memref<1x16x128xf32, #tpu.memory_space<vmem>>, vector<1x16x128xf32>
      %26 = vector.shape_cast %24 : vector<16x128xf32> to vector<1x16x128xf32>
      %cst_12 = arith.constant dense<0.000000e+00> : vector<16x128xf32>
      %27 = vector.multi_reduction <add>, %26, %cst_12 [0] : vector<1x16x128xf32> to vector<16x128xf32>
      %28 = vector.shape_cast %27 : vector<16x128xf32> to vector<1x16x128xf32>
      %29 = arith.addf %25, %28 : vector<1x16x128xf32>
      %c0_13 = arith.constant 0 : index
      %c0_14 = arith.constant 0 : index
      %c0_15 = arith.constant 0 : index
      %30 = vector.load %arg4[%c0_13, %c0_14, %c0_15] : memref<1x16x128xf32, #tpu.memory_space<vmem>>, vector<1x16x128xf32>
      tpu.vector_store %arg4[%c0_13, %c0_14, %c0_15], %29 {strides = array<i32>} : memref<1x16x128xf32, #tpu.memory_space<vmem>>, vector<1x16x128xf32>,
    } else {
    }
    return
  }
  func.func @transform_0(%arg0: i32, %arg1: i32) -> (i32, i32) {
    %c1_i32 = arith.constant 1 : i32
    %0 = arith.muli %arg0, %c1_i32 : i32
    %1 = arith.addi %0, %arg1 : i32
    %c0_i32 = arith.constant 0 : i32
    %2 = arith.minsi %1, %c0_i32 : i32
    %c0_i32_0 = arith.constant 0 : i32
    %c0_i32_1 = arith.constant 0 : i32
    return %2, %c0_i32_0 : i32, i32
  }
  func.func @transform_1(%arg0: i32, %arg1: i32) -> (i32, i32) {
    %c1_i32 = arith.constant 1 : i32
    %0 = arith.muli %arg0, %c1_i32 : i32
    %1 = arith.addi %0, %arg1 : i32
    %c0_i32 = arith.constant 0 : i32
    %2 = arith.minsi %1, %c0_i32 : i32
    %c0_i32_0 = arith.constant 0 : i32
    %c0_i32_1 = arith.constant 0 : i32
    return %2, %c0_i32_0 : i32, i32
  }
  func.func @transform_2(%arg0: i32, %arg1: i32) -> (i32, i32, i32) {
    %c0_i32 = arith.constant 0 : i32
    %c0_i32_0 = arith.constant 0 : i32
    %c0_i32_1 = arith.constant 0 : i32
    return %arg0, %c0_i32, %c0_i32_0 : i32, i32, i32
  }
}

</mosaic_0001>

<bundles_post_ra>
// kernel: tpu_custom_call.1
= control target key start
LH: loop header
LB: loop body
LE: loop exit
PB: predicated region body
PF: predicated region fallthrough
CT: control target
= control target key end

     0   :  { %7 = vsyncpa [#allocation3], 0  ;;  %s246_s0 = inlined_call_operand.hbm [shape: f32[16,128], index: 0, kind: input, shape index: {}]   ;;  %s247_s1 = inlined_call_operand.hbm [shape: f32[16,128], index: 1, kind: input, shape index: {}]   ;;  %s248_s2 = inlined_call_operand.hbm [shape: f32[1,16,128], index: 2, kind: output, shape index: {}]  }
   0x1   :  { %8 = vsyncpa [#allocation6], 0 }
   0x2   :  { %9 = vsyncpa [#allocation4], 0  ;;  %s208_s9 = smov [#allocation2]  }
   0x3   :  { %s21_s10 = sshll.u32 %s208_s9, 4  ;;  %s22_s10 = int_to_ptr.vmem [resolvable:$true] %s21_s10 }
   0x4   :  { %s150_s11 = scalar_lea.vmem %s22_s10, 256  ;;  %p155_p1 = scmp.lt.s32.totalorder %s22_s10, %s22_s10 }
   0x5   :  { %p151_p0 = scmp.ne.s32.totalorder %s22_s10, %s150_s11  ;;  %p156_p2 = scmp.lt.s32.totalorder %s150_s11, %s150_s11 }
   0x7   :  { %p157_p3 = por %p156_p2, %p155_p1 }
   0x9   :  { %p158_p4 = pnand %p157_p3, %p151_p0 }
   0xb   :  { %161 = shalt.err (!%p158_p4)
}
   0xc   :  { %s209_s12 = smov 128   ;;  %s210_s13 = smov 8  }
   0xd   :  { %27 = dma.hbm_to_vmem [thread:$0]  %s246_s0, 256, %s22_s10, [#allocation3], %s209_s12, %s209_s12, %s210_s13  }
   0xe   :  { %s211_s16 = smov [#allocation5]  }
   0xf   :  { %s39_s17 = sshll.u32 %s211_s16, 4  ;;  %s40_s17 = int_to_ptr.vmem [resolvable:$true] %s39_s17 }
  0x10   :  { %s170_s18 = scalar_lea.vmem %s40_s17, 256  ;;  %p175_p6 = scmp.lt.s32.totalorder %s40_s17, %s40_s17 }
  0x11   :  { %p171_p5 = scmp.ne.s32.totalorder %s40_s17, %s170_s18  ;;  %p176_p7 = scmp.lt.s32.totalorder %s170_s18, %s170_s18 }
  0x13   :  { %p177_p8 = por %p176_p7, %p175_p6 }
  0x15   :  { %p178_p9 = pnand %p177_p8, %p171_p5 }
  0x17   :  { %181 = shalt.err (!%p178_p9)
}
  0x18   :  { %45 = dma.hbm_to_vmem [thread:$0]  %s247_s1, 256, %s40_s17, [#allocation6], %s209_s12, %s209_s12, %s210_s13  }
  0x19   :  { %202 = dma.done.wait [#allocation3], 256  }
  0x1a   :  { %203 = vsyncadd [#allocation3], 4294967040 }
  0x1b   :  { %204 = dma.done.wait [#allocation6], 256  }
  0x1c   :  { %205 = vsyncadd [#allocation6], 4294967040  ;;  %v67_v0 = vld [vmem:[#allocation2] sm:$0xff]  ;;  %v69_v1 = vld [vmem:[#allocation5] sm:$0xff]  ;;  %s212_s0 = smov [#allocation7]  }
  0x1d   :  { %v68_v2 = vld [vmem:[#allocation2 + $0x8] sm:$0xff]  ;;  %v71_v3 = vsub.f32 %v67_v0, %v69_v1  ;;  %v70_v4 = vld [vmem:[#allocation5 + $0x8] sm:$0xff]  ;;  %s119_s21 = sshll.u32 %s212_s0, 4  ;;  %s120_s21 = int_to_ptr.vmem [resolvable:$true] %s119_s21 }
  0x1e   :  { %v72_v5 = vsub.f32 %v68_v2, %v70_v4  ;;  %s182_s22 = scalar_lea.vmem %s120_s21, 256  ;;  %p187_p11 = scmp.lt.s32.totalorder %s120_s21, %s120_s21 }
  0x1f   :  { %v73_v6 = vmul.f32 %v71_v3, %v71_v3  ;;  %p183_p10 = scmp.ne.s32.totalorder %s120_s21, %s182_s22  ;;  %p188_p12 = scmp.lt.s32.totalorder %s182_s22, %s182_s22 }
  0x20   :  { %v74_v7 = vmul.f32 %v72_v5, %v72_v5 }
  0x21   :  { %85 = vst [vmem:[#allocation7] sm:$0xff] %v73_v6  ;;  %p189_p13 = por %p188_p12, %p187_p11 }
  0x22   :  { %86 = vst [vmem:[#allocation7 + $0x8] sm:$0xff] %v74_v7 }
  0x23   :  { %p190_p0 = pnand %p189_p13, %p183_p10 }
  0x25   :  { %193 = shalt.err (!%p190_p0)
}
  0x26   :  { %125 = dma.vmem_to_hbm [thread:$0]  %s120_s21, 256, %s248_s2, [#allocation4], %s209_s12, %s209_s12, %s210_s13  }
  0x27   :  { %206 = dma.done.wait [#allocation4], 256  }
  0x28   :  { %207 = vsyncadd [#allocation4], 4294967040 }
  0x29   :  { %129 = vsyncpa [#allocation3], 1 }
  0x2a   :  { %130 = vsyncpa [#allocation6], 1 }
  0x2b   :  { %131 = vsyncpa [#allocation4], 1 }

</bundles_post_ra>
